<compile_context>
chip_gen: v6e
topology: v6e:2x2x1
jax: 0.10.0
libtpu: 0.0.40
codegen_flags: <defaults>
</compile_context>

<pallas_src>
from functools import partial

import jax
import jax.numpy as jnp
from jax.experimental import pallas as pl
from jax.experimental.pallas import tpu as pltpu


def _round_up(n, m):
    return (n + m - 1) // m * m


def shallownet_kernel(x_ref, w1_ref, b1_ref, w2_ref, b2_ref, out_ref, *, mxu_dtype=None):
    x = x_ref[...]
    w1 = w1_ref[...]
    # Optional low-precision MXU operands (weights already cast in the wrapper);
    # also reconciles any x/w1 dtype mismatch so we never hit silent promotion.
    if mxu_dtype is not None and x.dtype != mxu_dtype:
        x = x.astype(mxu_dtype)
    if x.dtype != w1.dtype:
        x = x.astype(w1.dtype)

    # fc1: (TB, K) @ (K, H_pad), f32 accumulation on the MXU.
    h = jnp.dot(x, w1, preferred_element_type=jnp.float32)
    # bias + ReLU in f32 (padded hidden columns stay exactly zero).
    h = jnp.maximum(h + b1_ref[...], 0.0)

    w2 = w2_ref[...]
    if h.dtype != w2.dtype:
        h = h.astype(w2.dtype)
    # fc2: (TB, H_pad) @ (H_pad, O_pad), f32 accumulation.
    o = jnp.dot(h, w2, preferred_element_type=jnp.float32)
    out_ref[...] = (o + b2_ref[...]).astype(out_ref.dtype)


def _vmem_bytes(TB, K, H_pad, O_pad, x_isz, w_isz, out_isz):
    x_buf = 2 * TB * K * x_isz                       # double-buffered input tiles
    out_buf = 2 * TB * O_pad * out_isz               # double-buffered output tiles
    w_buf = 2 * ((K * H_pad + H_pad * O_pad) * w_isz # resident weights (count 2x
                 + (H_pad + O_pad) * 4)              #  conservatively) + biases
    return x_buf + out_buf + w_buf


def _choose_tb(B, block_b):
    """Batch tile: multiple of 8 (or == B); >=2 tiles when splittable (v7x megacore)."""
    if B > block_b:
        return block_b
    half = _round_up(pl.cdiv(B, 2), 8)
    return half if half < B else B


def shallownet_forward(x, w1, b1, w2, b2, *, block_b=512, mxu_dtype=None):
    """Fused ShallowNet forward.

    x: (B, 784); w1: (784, H); b1: (H,); w2: (H, 10); b2: (10,).
    block_b: batch rows per grid step (multiple of 8).  512 works everywhere;
             larger values (2048-4096) are automatically clamped / sized against
             VMEM so they are safe on v5e/v6e/v7x.
    mxu_dtype: e.g. jnp.bfloat16 to feed the MXU low-precision operands
               (x HBM traffic stays f32; accumulation stays f32).  Recommended
               on v5e; leave None for bit-exact f32.
    """
    B, K = x.shape
    H = w1.shape[1]
    O = w2.shape[1]
    out_dtype = x.dtype

    # Lane-dense padded widths for the (tiny) resident weights.  K is NOT padded.
    H_pad = _round_up(H, 128)   # e.g. 32 -> 128
    O_pad = _round_up(O, 128)   # 10 -> 128

    w_dtype = mxu_dtype if mxu_dtype is not None else w1.dtype
    w1_p = jnp.zeros((K, H_pad), w_dtype).at[:, :H].set(w1.astype(w_dtype))
    b1_p = jnp.zeros((1, H_pad), jnp.float32).at[0, :H].set(b1.astype(jnp.float32))
    w2_p = jnp.zeros((H_pad, O_pad), w_dtype).at[:H, :O].set(w2.astype(w_dtype))
    b2_p = jnp.zeros((1, O_pad), jnp.float32).at[0, :O].set(b2.astype(jnp.float32))

    x_isz = jnp.dtype(x.dtype).itemsize
    w_isz = jnp.dtype(w_dtype).itemsize
    out_isz = jnp.dtype(out_dtype).itemsize

    # Pick TB, then clamp so buffers fit a 48 MiB budget (headroom on v7x's 64 MiB).
    VMEM_BUDGET = 48 * 1024 * 1024
    TB = max(1, _choose_tb(B, max(8, block_b)))
    while TB > 8 and _vmem_bytes(TB, K, H_pad, O_pad, x_isz, w_isz, out_isz) > VMEM_BUDGET:
        TB = max(8, (TB // 2) // 8 * 8)
    needed = _vmem_bytes(TB, K, H_pad, O_pad, x_isz, w_isz, out_isz)
    vmem_limit = max(32 * 1024 * 1024, needed + 4 * 1024 * 1024)  # <= ~52 MiB

    grid = (pl.cdiv(B, TB),)   # partial last tile handled by Pallas (rows independent)

    cost = pl.CostEstimate(
        flops=2 * B * (K * H_pad + H_pad * O_pad),
        transcendentals=0,
        bytes_accessed=int(B * K * x_isz + B * O_pad * out_isz
                           + (K * H_pad + H_pad * O_pad) * w_isz
                           + (H_pad + O_pad) * 4),
    )

    out_padded = pl.pallas_call(
        partial(shallownet_kernel, mxu_dtype=mxu_dtype),
        out_shape=jax.ShapeDtypeStruct((B, O_pad), out_dtype),
        grid_spec=pltpu.PrefetchScalarGridSpec(
            num_scalar_prefetch=0,
            grid=grid,
            in_specs=[
                # x: streamed unpadded, tiled over batch (double-buffered by Pallas).
                pl.BlockSpec((TB, K), lambda i: (i, 0)),
                # Weights / biases: full blocks, resident in VMEM across all tiles.
                pl.BlockSpec((K, H_pad), lambda i: (0, 0)),
                pl.BlockSpec((1, H_pad), lambda i: (0, 0)),
                pl.BlockSpec((H_pad, O_pad), lambda i: (0, 0)),
                pl.BlockSpec((1, O_pad), lambda i: (0, 0)),
            ],
            out_specs=pl.BlockSpec((TB, O_pad), lambda i: (i, 0)),
        ),
        compiler_params=pltpu.CompilerParams(
            # Batch tiles are independent -> shard across both TCs on v7x.
            dimension_semantics=("parallel",),
            vmem_limit_bytes=int(vmem_limit),
        ),
        cost_estimate=cost,
    )(x, w1_p, b1_p, w2_p, b2_p)

    # Strip the lane padding of the output (tiny wrapper-side slice).
    return out_padded[:, :O]


def init_params(key, in_features=784, hidden=32, out_features=10):
    """Deterministic PyTorch-style init: U(-1/sqrt(fan_in), 1/sqrt(fan_in))."""
    k1, k2, k3, k4 = jax.random.split(key, 4)
    bound1 = 1.0 / jnp.sqrt(in_features)
    bound2 = 1.0 / jnp.sqrt(hidden)
    # stored transposed vs. PyTorch: (in, out)
    w1 = jax.random.uniform(k1, (in_features, hidden), jnp.float32,
                            minval=-bound1, maxval=bound1)
    b1 = jax.random.uniform(k2, (hidden,), jnp.float32,
                            minval=-bound1, maxval=bound1)
    w2 = jax.random.uniform(k3, (hidden, out_features), jnp.float32,
                            minval=-bound2, maxval=bound2)
    b2 = jax.random.uniform(k4, (out_features,), jnp.float32,
                            minval=-bound2, maxval=bound2)
    return w1, b1, w2, b2


if __name__ == "__main__":
    key = jax.random.PRNGKey(0)
    kx, kp = jax.random.split(key)

    B, IN, H, OUT = 2, 784, 32, 10
    x = jax.random.normal(kx, (B, IN), jnp.float32)
    w1, b1, w2, b2 = init_params(kp, IN, H, OUT)

    out = shallownet_forward(x, w1, b1, w2, b2)
    out = jax.block_until_ready(out)

    # reference check in plain JAX (exact f32 path)
    ref = jnp.maximum(x @ w1 + b1, 0.0) @ w2 + b2
    assert out.shape == (B, OUT)
    assert jnp.allclose(out, ref, atol=1e-4, rtol=1e-4)

    print("KERNEL_OK")
</pallas_src>

<mosaic_0001>
module attributes {stable_mosaic.version = 11 : i64} {
  func.func @shallownet_kernel(%arg0: i32, %arg1: memref<2x784xf32, #tpu.memory_space<vmem>>, %arg2: memref<784x128xf32, #tpu.memory_space<vmem>>, %arg3: memref<1x128xf32, #tpu.memory_space<vmem>>, %arg4: memref<128x128xf32, #tpu.memory_space<vmem>>, %arg5: memref<1x128xf32, #tpu.memory_space<vmem>>, %arg6: memref<2x128xf32, #tpu.memory_space<vmem>>) attributes {dimension_semantics = [#tpu.dimension_semantics<parallel>], iteration_bounds = array<i64: 1>, scalar_prefetch = 0 : i64, scratch_operands = 0 : i64, tpu.core_type = #tpu.core_type<tc>, window_params = [{transform_indices = @transform_0, window_bounds = array<i64: 2, 784>}, {pipeline_mode = #tpu.pipeline_mode<synchronous>, transform_indices = @transform_1, window_bounds = array<i64: 784, 128>}, {pipeline_mode = #tpu.pipeline_mode<synchronous>, transform_indices = @transform_2, window_bounds = array<i64: 1, 128>}, {pipeline_mode = #tpu.pipeline_mode<synchronous>, transform_indices = @transform_3, window_bounds = array<i64: 128, 128>}, {pipeline_mode = #tpu.pipeline_mode<synchronous>, transform_indices = @transform_4, window_bounds = array<i64: 1, 128>}, {transform_indices = @transform_5, window_bounds = array<i64: 2, 128>}]} {
    %c0 = arith.constant 0 : index
    %c0_0 = arith.constant 0 : index
    %0 = vector.load %arg1[%c0, %c0_0] : memref<2x784xf32, #tpu.memory_space<vmem>>, vector<2x784xf32>
    %c0_1 = arith.constant 0 : index
    %c0_2 = arith.constant 0 : index
    %1 = vector.load %arg2[%c0_1, %c0_2] : memref<784x128xf32, #tpu.memory_space<vmem>>, vector<784x128xf32>
    %cst = arith.constant dense<0.000000e+00> : vector<2x128xf32>
    %2 = tpu.matmul %0, %1, %cst {dimension_numbers = #tpu.dot_dimension_numbers<[1], [0], [0], [1], [0, 0, 1, 1], [], []>} : vector<2x784xf32>, vector<784x128xf32>, vector<2x128xf32> -> vector<2x128xf32>
    %c0_3 = arith.constant 0 : index
    %c0_4 = arith.constant 0 : index
    %3 = vector.load %arg3[%c0_3, %c0_4] : memref<1x128xf32, #tpu.memory_space<vmem>>, vector<1x128xf32>
    %4 = vector.broadcast %3 : vector<1x128xf32> to vector<2x128xf32>
    %5 = arith.addf %2, %4 : vector<2x128xf32>
    %cst_5 = arith.constant 0.000000e+00 : f32
    %6 = vector.broadcast %cst_5 : f32 to vector<2x128xf32>
    %7 = arith.maximumf %5, %6 : vector<2x128xf32>
    %c0_6 = arith.constant 0 : index
    %c0_7 = arith.constant 0 : index
    %8 = vector.load %arg4[%c0_6, %c0_7] : memref<128x128xf32, #tpu.memory_space<vmem>>, vector<128x128xf32>
    %cst_8 = arith.constant dense<0.000000e+00> : vector<2x128xf32>
    %9 = tpu.matmul %7, %8, %cst_8 {dimension_numbers = #tpu.dot_dimension_numbers<[1], [0], [0], [1], [0, 0, 1, 1], [], []>} : vector<2x128xf32>, vector<128x128xf32>, vector<2x128xf32> -> vector<2x128xf32>
    %c0_9 = arith.constant 0 : index
    %c0_10 = arith.constant 0 : index
    %10 = vector.load %arg5[%c0_9, %c0_10] : memref<1x128xf32, #tpu.memory_space<vmem>>, vector<1x128xf32>
    %11 = vector.broadcast %10 : vector<1x128xf32> to vector<2x128xf32>
    %12 = arith.addf %9, %11 : vector<2x128xf32>
    %c0_11 = arith.constant 0 : index
    %c0_12 = arith.constant 0 : index
    %13 = vector.load %arg6[%c0_11, %c0_12] : memref<2x128xf32, #tpu.memory_space<vmem>>, vector<2x128xf32>
    tpu.vector_store %arg6[%c0_11, %c0_12], %12 {strides = array<i32>} : memref<2x128xf32, #tpu.memory_space<vmem>>, vector<2x128xf32>,
    return
  }
  func.func @transform_0(%arg0: i32) -> (i32, i32) {
    %c0_i32 = arith.constant 0 : i32
    %c0_i32_0 = arith.constant 0 : i32
    return %arg0, %c0_i32 : i32, i32
  }
  func.func @transform_1(%arg0: i32) -> (i32, i32) {
    %c0_i32 = arith.constant 0 : i32
    %c0_i32_0 = arith.constant 0 : i32
    %c0_i32_1 = arith.constant 0 : i32
    return %c0_i32, %c0_i32_0 : i32, i32
  }
  func.func @transform_2(%arg0: i32) -> (i32, i32) {
    %c0_i32 = arith.constant 0 : i32
    %c0_i32_0 = arith.constant 0 : i32
    %c0_i32_1 = arith.constant 0 : i32
    return %c0_i32, %c0_i32_0 : i32, i32
  }
  func.func @transform_3(%arg0: i32) -> (i32, i32) {
    %c0_i32 = arith.constant 0 : i32
    %c0_i32_0 = arith.constant 0 : i32
    %c0_i32_1 = arith.constant 0 : i32
    return %c0_i32, %c0_i32_0 : i32, i32
  }
  func.func @transform_4(%arg0: i32) -> (i32, i32) {
    %c0_i32 = arith.constant 0 : i32
    %c0_i32_0 = arith.constant 0 : i32
    %c0_i32_1 = arith.constant 0 : i32
    return %c0_i32, %c0_i32_0 : i32, i32
  }
  func.func @transform_5(%arg0: i32) -> (i32, i32) {
    %c0_i32 = arith.constant 0 : i32
    %c0_i32_0 = arith.constant 0 : i32
    return %arg0, %c0_i32 : i32, i32
  }
}

</mosaic_0001>

<bundles_post_ra>
// kernel: tpu_custom_call.1
= control target key start
LH: loop header
LB: loop body
LE: loop exit
PB: predicated region body
PF: predicated region fallthrough
CT: control target
= control target key end

     0   :  { %10 = vsyncpa [#allocation3], 0  ;;  %s957_s0 = inlined_call_operand.hbm [shape: f32[2,784], index: 0, kind: input, shape index: {}]   ;;  %s958_s1 = inlined_call_operand.hbm [shape: f32[784,128], index: 1, kind: input, shape index: {}]   ;;  %s959_s2 = inlined_call_operand.vmem [shape: f32[1,128], index: 2, kind: input, shape index: {}]   ;;  %s960_s3 = inlined_call_operand.hbm [shape: f32[128,128], index: 3, kind: input, shape index: {}]   ;;  %s961_s4 = inlined_call_operand.vmem [shape: f32[1,128], index: 4, kind: input, shape index: {}]   ;;  %s962_s5 = inlined_call_operand.hbm [shape: f32[2,128], index: 5, kind: output, shape index: {}]  }
   0x1   :  { %11 = vsyncpa [#allocation6], 0 }
   0x2   :  { %12 = vsyncpa [#allocation4], 0  ;;  %s869_s18 = smov [#allocation5]  }
   0x3   :  { %s28_s19 = sshll.u32 %s869_s18, 4  ;;  %s29_s19 = int_to_ptr.vmem [resolvable:$true] %s28_s19 }
   0x4   :  { %s791_s20 = scalar_lea.vmem %s29_s19, 12544  ;;  %p796_p1 = scmp.lt.s32.totalorder %s29_s19, %s29_s19 }
   0x5   :  { %p792_p0 = scmp.ne.s32.totalorder %s29_s19, %s791_s20  ;;  %p797_p2 = scmp.lt.s32.totalorder %s791_s20, %s791_s20 }
   0x7   :  { %p798_p3 = por %p797_p2, %p796_p1 }
   0x9   :  { %p799_p4 = pnand %p798_p3, %p792_p0 }
   0xb   :  { %802 = shalt.err (!%p799_p4)
}
   0xc   :  { %s870_s21 = smov 128   ;;  %s871_s22 = smov 8  }
   0xd   :  { %34 = dma.hbm_to_vmem [thread:$0]  %s958_s1, 12544, %s29_s19, [#allocation6], %s870_s21, %s870_s21, %s871_s22  }
   0xe   :  { %s872_s25 = smov [#allocation2]   ;;  %s873_s27 = smov [#allocation7]  }
   0xf   :  { %s19_s26 = sshll.u32 %s872_s25, 4  ;;  %s42_s28 = sshll.u32 %s873_s27, 4  ;;  %s20_s26 = int_to_ptr.vmem [resolvable:$true] %s19_s26  ;;  %s43_s28 = int_to_ptr.vmem [resolvable:$true] %s42_s28 }
  0x10   :  { %s811_s29 = scalar_lea.vmem %s20_s26, 224  ;;  %p816_p6 = scmp.lt.s32.totalorder %s20_s26, %s20_s26 }
  0x11   :  { %p812_p5 = scmp.ne.s32.totalorder %s20_s26, %s811_s29  ;;  %p817_p7 = scmp.lt.s32.totalorder %s811_s29, %s811_s29 }
  0x13   :  { %p818_p8 = por %p817_p7, %p816_p6 }
  0x15   :  { %p819_p9 = pnand %p818_p8, %p812_p5 }
  0x17   :  { %822 = shalt.err (!%p819_p9)
}
  0x18   :  { %22 = dma.hbm_to_vmem [thread:$0]  %s957_s0, 224, %s20_s26, [#allocation3]  }
  0x19   :  { %s831_s7 = scalar_lea.vmem %s43_s28, 2048  ;;  %p836_p11 = scmp.lt.s32.totalorder %s43_s28, %s43_s28 }
  0x1a   :  { %p832_p10 = scmp.ne.s32.totalorder %s43_s28, %s831_s7  ;;  %p837_p12 = scmp.lt.s32.totalorder %s831_s7, %s831_s7 }
  0x1c   :  { %p838_p13 = por %p837_p12, %p836_p11 }
  0x1e   :  { %p839_p0 = pnand %p838_p13, %p832_p10 }
  0x20   :  { %842 = shalt.err (!%p839_p0)
}
  0x21   :  { %48 = dma.hbm_to_vmem [thread:$0]  %s960_s3, 2048, %s43_s28, [#allocation6], %s870_s21, %s870_s21, %s871_s22  }
  0x22   :  { %863 = dma.done.wait [#allocation3], 224  }
  0x23   :  { %864 = vsyncadd [#allocation3], 4294967072 }
  0x24   :  { %865 = dma.done.wait [#allocation6], 14592  }
  0x25   :  { %866 = vsyncadd [#allocation6], 4294952704  ;;  %v93_v0 = vld [vmem:[#allocation5 + $0xf8] sm:$0xff]  ;;  %v92_v2 = vld [vmem:[#allocation5 + $0xf0] sm:$0xff]  ;;  %v874_v27 = vmov 1983009808   ;;  %v173_v29 = vlaneseq }
  0x26   :  { %v77_v1 = vld [vmem:[#allocation5 + $0x78] sm:$0xff]  ;;  %605 = vmatprep.subr.mxu0 %v93_v0  ;;  %v76_v4 = vld [vmem:[#allocation5 + $0x70] sm:$0xff]  ;;  %v91_v6 = vld [vmem:[#allocation5 + $0xe8] sm:$0xff]  ;;  %v171_v28 = vunpack.c.l.s4 %v874_v27  ;;  %vm208_vm0 = vcmask 130048   ;;  %vm876_vm1 = vmmov 0   ;;  %s877_s11 = smov [#allocation8]  }
  0x27   :  { %v125_v3 = vld [vmem:[#allocation5 + $0x1f8] sm:$0xff]  ;;  %606 = vmatpush3.msra.mxu0 %v77_v1  ;;  %v124_v7 = vld [vmem:[#allocation5 + $0x1f0] sm:$0xff]  ;;  %v75_v8 = vld [vmem:[#allocation5 + $0x68] sm:$0xff]  ;;  %v174_v39 = vshrl.u32 %v173_v29, 7  ;;  %s592_s12 = sshll.u32 %s877_s11, 4  ;;  %s593_s12 = int_to_ptr.vmem [resolvable:$true] %s592_s12 }
  0x28   :  { %v109_v5 = vld [vmem:[#allocation5 + $0x178] sm:$0xff]  ;;  %640 = vmatprep.subr.mxu1 %v125_v3  ;;  %607 = vmatprep.subr.mxu0 %v92_v2  ;;  %v108_v9 = vld [vmem:[#allocation5 + $0x170] sm:$0xff]  ;;  %v123_v10 = vld [vmem:[#allocation5 + $0x1e8] sm:$0xff]  ;;  %v172_v38 = vunpack.c.0.s8 %v171_v28  ;;  %p848_p2 = scmp.lt.s32.totalorder %s593_s12, %s593_s12 }
  0x29   :  { %641 = vmatpush3.msra.mxu1 %v109_v5  ;;  %608 = vmatpush3.msra.mxu0 %v76_v4  ;;  %v90_v11 = vld [vmem:[#allocation5 + $0xe0] sm:$0xff]  ;;  %v107_v12 = vld [vmem:[#allocation5 + $0x168] sm:$0xff]  ;;  %v89_v15 = vld [vmem:[#allocation5 + $0xd8] sm:$0xff] }
  0x2a   :  { %642 = vmatprep.subr.mxu1 %v124_v7  ;;  %609 = vmatprep.subr.mxu0 %v91_v6  ;;  %v74_v13 = vld [vmem:[#allocation5 + $0x60] sm:$0xff]  ;;  %v73_v17 = vld [vmem:[#allocation5 + $0x58] sm:$0xff]  ;;  %v88_v19 = vld [vmem:[#allocation5 + $0xd0] sm:$0xff]  ;;  %v917_v48 = vsub.s32 %v172_v38, %v174_v39 }
  0x2b   :  { %643 = vmatpush3.msra.mxu1 %v108_v9  ;;  %v122_v14 = vld [vmem:[#allocation5 + $0x1e0] sm:$0xff]  ;;  %610 = vmatpush3.msra.mxu0 %v75_v8  ;;  %v121_v18 = vld [vmem:[#allocation5 + $0x1d8] sm:$0xff]  ;;  %v72_v21 = vld [vmem:[#allocation5 + $0x50] sm:$0xff] }
  0x2c   :  { %644 = vmatprep.subr.mxu1 %v123_v10  ;;  %v106_v16 = vld [vmem:[#allocation5 + $0x160] sm:$0xff]  ;;  %611 = vmatprep.subr.mxu0 %v90_v11  ;;  %v105_v20 = vld [vmem:[#allocation5 + $0x158] sm:$0xff]  ;;  %v120_v22 = vld [vmem:[#allocation5 + $0x1d0] sm:$0xff] }
  0x2d   :  { %645 = vmatpush3.msra.mxu1 %v107_v12  ;;  %612 = vmatpush3.msra.mxu0 %v74_v13  ;;  %v87_v23 = vld [vmem:[#allocation5 + $0xc8] sm:$0xff]  ;;  %v104_v24 = vld [vmem:[#allocation5 + $0x150] sm:$0xff]  ;;  %v86_v30 = vld [vmem:[#allocation5 + $0xc0] sm:$0xff] }
  0x2e   :  { %646 = vmatprep.subr.mxu1 %v122_v14  ;;  %613 = vmatprep.subr.mxu0 %v89_v15  ;;  %v71_v25 = vld [vmem:[#allocation5 + $0x48] sm:$0xff]  ;;  %v70_v32 = vld [vmem:[#allocation5 + $0x40] sm:$0xff]  ;;  %v85_v34 = vld [vmem:[#allocation5 + $0xb8] sm:$0xff] }
  0x2f   :  { %647 = vmatpush3.msra.mxu1 %v106_v16  ;;  %614 = vmatpush3.msra.mxu0 %v73_v17  ;;  %v119_v26 = vld [vmem:[#allocation5 + $0x1c8] sm:$0xff]  ;;  %v118_v33 = vld [vmem:[#allocation5 + $0x1c0] sm:$0xff]  ;;  %v69_v36 = vld [vmem:[#allocation5 + $0x38] sm:$0xff] }
  0x30   :  { %648 = vmatprep.subr.mxu1 %v121_v18  ;;  %615 = vmatprep.subr.mxu0 %v88_v19  ;;  %v103_v31 = vld [vmem:[#allocation5 + $0x148] sm:$0xff]  ;;  %v102_v35 = vld [vmem:[#allocation5 + $0x140] sm:$0xff]  ;;  %v117_v37 = vld [vmem:[#allocation5 + $0x1b8] sm:$0xff] }
  0x31   :  { %649 = vmatpush3.msra.mxu1 %v105_v20  ;;  %616 = vmatpush3.msra.mxu0 %v72_v21  ;;  %v84_v40 = vld [vmem:[#allocation5 + $0xb0] sm:$0xff]  ;;  %v101_v41 = vld [vmem:[#allocation5 + $0x138] sm:$0xff]  ;;  %v83_v44 = vld [vmem:[#allocation5 + $0xa8] sm:$0xff] }
  0x32   :  { %650 = vmatprep.subr.mxu1 %v120_v22  ;;  %617 = vmatprep.subr.mxu0 %v87_v23  ;;  %v68_v42 = vld [vmem:[#allocation5 + $0x30] sm:$0xff]  ;;  %v67_v46 = vld [vmem:[#allocation5 + $0x28] sm:$0xff]  ;;  %v82_v49 = vld [vmem:[#allocation5 + $0xa0] sm:$0xff] }
  0x33   :  { %651 = vmatpush3.msra.mxu1 %v104_v24  ;;  %618 = vmatpush3.msra.mxu0 %v71_v25  ;;  %v116_v43 = vld [vmem:[#allocation5 + $0x1b0] sm:$0xff]  ;;  %v115_v47 = vld [vmem:[#allocation5 + $0x1a8] sm:$0xff]  ;;  %v66_v52 = vld [vmem:[#allocation5 + $0x20] sm:$0xff]  ;;  %v875_v25 = vmov 0.0  }
  0x34   :  { %652 = vmatprep.subr.mxu1 %v119_v26  ;;  %619 = vmatprep.subr.mxu0 %v86_v30  ;;  %v100_v45 = vld [vmem:[#allocation5 + $0x130] sm:$0xff]  ;;  %v99_v50 = vld [vmem:[#allocation5 + $0x128] sm:$0xff]  ;;  %v114_v53 = vld [vmem:[#allocation5 + $0x1a0] sm:$0xff] }
  0x35   :  { %653 = vmatpush3.msra.mxu1 %v103_v31  ;;  %620 = vmatpush3.msra.mxu0 %v70_v32  ;;  %v60_v51 = vld [vmem:[#allocation2] sm:$0xff]  ;;  %v98_v55 = vld [vmem:[#allocation5 + $0x120] sm:$0xff]  ;;  %v79_v0 = vld [vmem:[#allocation5 + $0x88] sm:$0xff] }
  0x36   :  { %654 = vmatprep.subr.mxu1 %v118_v33  ;;  %621 = vmatprep.subr.mxu0 %v85_v34  ;;  %v81_v54 = vld [vmem:[#allocation5 + $0x98] sm:$0xff]  ;;  %v176_v58 = vrot.slane %v60_v51, %v917_v48  ;;  %v169_v59 = vcombine.high %v60_v51, %v60_v51  ;;  %v80_v60 = vld [vmem:[#allocation5 + $0x90] sm:$0xff]  ;;  %v63_v2 = vld [vmem:[#allocation5 + $0x8] sm:$0xff] }
  0x37   :  { %655 = vmatpush3.msra.mxu1 %v102_v35  ;;  %622 = vmatpush3.msra.mxu0 %v69_v36  ;;  %v65_v56 = vld [vmem:[#allocation5 + $0x18] sm:$0xff]  ;;  %v64_v62 = vld [vmem:[#allocation5 + $0x10] sm:$0xff]  ;;  %v111_v3 = vld [vmem:[#allocation5 + $0x188] sm:$0xff] }
  0x38   :  { %656 = vmatprep.subr.mxu1 %v117_v37  ;;  %623 = vmatprep.subr.mxu0 %v84_v40  ;;  %v113_v57 = vld [vmem:[#allocation5 + $0x198] sm:$0xff]  ;;  %v112_v63 = vld [vmem:[#allocation5 + $0x190] sm:$0xff]  ;;  %v184_v4 = vcombine.high %v176_v58, %v176_v58  ;;  %v183_v5 = vrot.slane %v169_v59, %v917_v48  ;;  %v78_v6 = vld [vmem:[#allocation5 + $0x80] sm:$0xff] }
  0x39   :  { %657 = vmatpush3.msra.mxu1 %v101_v41  ;;  %624 = vmatpush3.msra.mxu0 %v68_v42  ;;  %v97_v61 = vld [vmem:[#allocation5 + $0x118] sm:$0xff]  ;;  %v96_v1 = vld [vmem:[#allocation5 + $0x110] sm:$0xff]  ;;  %v62_v7 = vld [vmem:[#allocation5] sm:$0xff] }
  0x3a   :  { %658 = vmatprep.subr.mxu1 %v116_v43  ;;  %625 = vmatprep.subr.mxu0 %v83_v44  ;;  %v95_v8 = vld [vmem:[#allocation5 + $0x108] sm:$0xff]  ;;  %v110_v9 = vld [vmem:[#allocation5 + $0x180] sm:$0xff]  ;;  %v157_v10 = vld [vmem:[#allocation5 + $0x2f8] sm:$0xff]  ;;  %v185_v12 = vcombine.high %v183_v5, %v183_v5 }
  0x3b   :  { %659 = vmatpush3.msra.mxu1 %v100_v45  ;;  %626 = vmatpush3.msra.mxu0 %v67_v46  ;;  %v94_v11 = vld [vmem:[#allocation5 + $0x100] sm:$0xff]  ;;  %v141_v13 = vld [vmem:[#allocation5 + $0x278] sm:$0xff]  ;;  %v156_v15 = vld [vmem:[#allocation5 + $0x2f0] sm:$0xff] }
  0x3c   :  { %660 = vmatprep.subr.mxu1 %v115_v47  ;;  %627 = vmatprep.subr.mxu0 %v82_v49  ;;  %v61_v14 = vld [vmem:[#allocation2 + $0x8] sm:$0x3f]  ;;  %v140_v17 = vld [vmem:[#allocation5 + $0x270] sm:$0xff]  ;;  %v155_v18 = vld [vmem:[#allocation5 + $0x2e8] sm:$0xff] }
  0x3d   :  { %661 = vmatpush3.msra.mxu1 %v99_v50  ;;  %628 = vmatpush3.msra.mxu0 %v66_v52  ;;  %v922_v16 = vrot.slane %v61_v14, %v917_v48  ;;  %v186_v19 = vcombine.high %v61_v14, %v61_v14  ;;  %v139_v21 = vld [vmem:[#allocation5 + $0x268] sm:$0xff]  ;;  %v154_v23 = vld [vmem:[#allocation5 + $0x2e0] sm:$0xff]  ;;  %v153_v27 = vld [vmem:[#allocation5 + $0x2d8] sm:$0xff] }
  0x3e   :  { %662 = vmatprep.subr.mxu1 %v114_v53  ;;  %629 = vmatprep.subr.mxu0 %v81_v54  ;;  %v159_v22 = vld [vmem:[#allocation5 + $0x308] sm:$0xff]  ;;  %v138_v24 = vld [vmem:[#allocation5 + $0x260] sm:$0xff]  ;;  %v137_v29 = vld [vmem:[#allocation5 + $0x258] sm:$0xff] }
  0x3f   :  { %663 = vmatpush3.msra.mxu1 %v98_v55  ;;  %630 = vmatpush3.msra.mxu0 %v65_v56  ;;  %v201_v20 = vcombine.high %v922_v16, %v922_v16  ;;  %v158_v26 = vld [vmem:[#allocation5 + $0x300] sm:$0xff]  ;;  %v200_v28 = vrot.slane %v186_v19, %v917_v48  ;;  %v152_v30 = vld [vmem:[#allocation5 + $0x2d0] sm:$0xff]  ;;  %v151_v32 = vld [vmem:[#allocation5 + $0x2c8] sm:$0xff] }
  0x40   :  { %664 = vmatprep.subr.mxu1 %v113_v57  ;;  %631 = vmatprep.subr.mxu0 %v80_v60  ;;  %v136_v31 = vld [vmem:[#allocation5 + $0x250] sm:$0xff]  ;;  %v135_v33 = vld [vmem:[#allocation5 + $0x248] sm:$0xff]  ;;  %v150_v34 = vld [vmem:[#allocation5 + $0x2c0] sm:$0xff] }
  0x41   :  { %665 = vmatpush3.msra.mxu1 %v97_v61  ;;  %632 = vmatpush3.msra.mxu0 %v64_v62  ;;  %v134_v35 = vld [vmem:[#allocation5 + $0x240] sm:$0xff]  ;;  %v149_v36 = vld [vmem:[#allocation5 + $0x2b8] sm:$0xff]  ;;  %v148_v38 = vld [vmem:[#allocation5 + $0x2b0] sm:$0xff] }
  0x42   :  { %666 = vmatprep.subr.mxu1 %v112_v63  ;;  %633 = vmatprep.subr.mxu0 %v79_v0  ;;  %v133_v37 = vld [vmem:[#allocation5 + $0x238] sm:$0xff]  ;;  %v132_v39 = vld [vmem:[#allocation5 + $0x230] sm:$0xff]  ;;  %v147_v40 = vld [vmem:[#allocation5 + $0x2a8] sm:$0xff] }
  0x43   :  { %667 = vmatpush3.msra.mxu1 %v96_v1  ;;  %634 = vmatpush3.msra.mxu0 %v63_v2  ;;  %v131_v41 = vld [vmem:[#allocation5 + $0x228] sm:$0xff]  ;;  %v146_v42 = vld [vmem:[#allocation5 + $0x2a0] sm:$0xff]  ;;  %v145_v44 = vld [vmem:[#allocation5 + $0x298] sm:$0xff] }
  0x44   :  { %668 = vmatprep.subr.mxu1 %v111_v3  ;;  %635 = vmatprep.subr.mxu0 %v78_v6  ;;  %v130_v43 = vld [vmem:[#allocation5 + $0x220] sm:$0xff]  ;;  %v129_v45 = vld [vmem:[#allocation5 + $0x218] sm:$0xff]  ;;  %v144_v46 = vld [vmem:[#allocation5 + $0x290] sm:$0xff] }
  0x45   :  { %275 = vmatprep.mubr.f32.mxu0 %v184_v4  ;;  %636 = vmatpush3.msra.mxu0 %v62_v7  ;;  %v128_v47 = vld [vmem:[#allocation5 + $0x210] sm:$0xff]  ;;  %v143_v48 = vld [vmem:[#allocation5 + $0x288] sm:$0xff]  ;;  %v142_v50 = vld [vmem:[#allocation5 + $0x280] sm:$0xff] }
  0x46   :  { %669 = vmatpush3.msra.mxu1 %v95_v8  ;;  %276 = vmatmul.mubr.f32.vlgmr.msra.gmra.mxu0 %v176_v58  ;;  %v127_v49 = vld [vmem:[#allocation5 + $0x208] sm:$0xff]  ;;  %v126_v51 = vld [vmem:[#allocation5 + $0x200] sm:$0xff]  ;;  %v505_v54 = vld [vmem:[#allocation7 + $0x68] sm:$0xff] }
  0x47   :  { %670 = vmatprep.subr.mxu1 %v110_v9  ;;  %675 = vmatprep.subr.mxu0 %v157_v10  ;;  %v507_v52 = vld [vmem:[#allocation7 + $0x78] sm:$0xff]  ;;  %v506_v53 = vld [vmem:[#allocation7 + $0x70] sm:$0xff]  ;;  %v504_v55 = vld [vmem:[#allocation7 + $0x60] sm:$0xff] }
  0x48   :  { %671 = vmatpush3.msra.mxu1 %v94_v11  ;;  %345 = vmatprep.mubr.f32.mxu1 %v185_v12  ;;  %v503_v56 = vld [vmem:[#allocation7 + $0x58] sm:$0xff]  ;;  %v502_v57 = vld [vmem:[#allocation7 + $0x50] sm:$0xff]  ;;  %v501_v58 = vld [vmem:[#allocation7 + $0x48] sm:$0xff] }
  0x49   :  { %676 = vmatpush3.msra.mxu0 %v141_v13  ;;  %346 = vmatmul.mubr.f32.vlgmr.msra.gmra.mxu1 %v183_v5  ;;  %v500_v59 = vld [vmem:[#allocation7 + $0x40] sm:$0xff]  ;;  %v499_v60 = vld [vmem:[#allocation7 + $0x38] sm:$0xff]  ;;  %v498_v61 = vld [vmem:[#allocation7 + $0x30] sm:$0xff] }
  0x4a   :  { %677 = vmatprep.subr.mxu0 %v156_v15  ;;  %415 = vmatprep.mubr.f32.mxu0 %v201_v20  ;;  %v497_v62 = vld [vmem:[#allocation7 + $0x28] sm:$0xff]  ;;  %v496_v63 = vld [vmem:[#allocation7 + $0x20] sm:$0xff]  ;;  %v495_v0 = vld [vmem:[#allocation7 + $0x18] sm:$0xff] }
  0x4b   :  { %678 = vmatpush3.msra.mxu0 %v140_v17  ;;  %730 = vmatprep.subr.mxu1 %v875_v25  ;;  %v494_v1 = vld [vmem:[#allocation7 + $0x10] sm:$0xff]  ;;  %v493_v2 = vld [vmem:[#allocation7 + $0x8] sm:$0xff]  ;;  %v492_v3 = vld [vmem:[#allocation7] sm:$0xff] }
  0x4c   :  { %679 = vmatprep.subr.mxu0 %v155_v18  ;;  %731 = vmatpush3.msra.mxu1 %v159_v22  ;;  %v602_v11 = vld [vmem:[%s959_s2] ss:$0 sm:$0xff]  ;;  %s843_s2 = scalar_lea.vmem %s593_s12, 32 }
  0x4d   :  { %680 = vmatpush3.msra.mxu0 %v139_v21  ;;  %732 = vmatprep.subr.mxu1 %v875_v25  ;;  %v604_v21 = vld [vmem:[%s961_s4] ss:$0 sm:$0xff]  ;;  %p844_p1 = scmp.ne.s32.totalorder %s593_s12, %s843_s2  ;;  %p849_p3 = scmp.lt.s32.totalorder %s843_s2, %s843_s2 }
  0x4e   :  { %681 = vmatprep.subr.mxu0 %v154_v23  ;;  %733 = vmatpush3.msra.mxu1 %v158_v26 }
  0x4f   :  { %682 = vmatpush3.msra.mxu0 %v138_v24  ;;  %734 = vmatprep.mubr.msk.f32.mxu1 %vm876_vm1, %v875_v25  ;;  %p850_p4 = por %p849_p3, %p848_p2 }
  0x50   :  { %683 = vmatprep.subr.mxu0 %v153_v27  ;;  %735 = vmatmul.mubr.msk.f32.vlgmr.msra.gmra.mxu1 %vm208_vm0, %v200_v28 }
  0x51   :  { %684 = vmatpush3.msra.mxu0 %v137_v29  ;;  %737 = vmatprep.subr.mxu1 %v875_v25  ;;  %p851_p5 = pnand %p850_p4, %p844_p1 }
  0x52   :  { %685 = vmatprep.subr.mxu0 %v152_v30  ;;  %769 = vmatprep.mubr.msk.f32.mxu1 %vm876_vm1, %v875_v25 }
  0x53   :  { %686 = vmatpush3.msra.mxu0 %v136_v31  ;;  %738 = vmatpush3.msra.mxu1 %v507_v52 }
  0x54   :  { %687 = vmatprep.subr.mxu0 %v151_v32  ;;  %739 = vmatprep.subr.mxu1 %v875_v25 }
  0x55   :  { %688 = vmatpush3.msra.mxu0 %v135_v33  ;;  %740 = vmatpush3.msra.mxu1 %v506_v53 }
  0x56   :  { %689 = vmatprep.subr.mxu0 %v150_v34  ;;  %741 = vmatprep.subr.mxu1 %v875_v25 }
  0x57   :  { %690 = vmatpush3.msra.mxu0 %v134_v35  ;;  %742 = vmatpush3.msra.mxu1 %v505_v54 }
  0x58   :  { %691 = vmatprep.subr.mxu0 %v149_v36  ;;  %743 = vmatprep.subr.mxu1 %v875_v25 }
  0x59   :  { %692 = vmatpush3.msra.mxu0 %v133_v37  ;;  %744 = vmatpush3.msra.mxu1 %v504_v55 }
  0x5a   :  { %693 = vmatprep.subr.mxu0 %v148_v38  ;;  %745 = vmatprep.subr.mxu1 %v875_v25 }
  0x5b   :  { %694 = vmatpush3.msra.mxu0 %v132_v39  ;;  %746 = vmatpush3.msra.mxu1 %v503_v56 }
  0x5c   :  { %695 = vmatprep.subr.mxu0 %v147_v40  ;;  %747 = vmatprep.subr.mxu1 %v875_v25 }
  0x5d   :  { %696 = vmatpush3.msra.mxu0 %v131_v41  ;;  %748 = vmatpush3.msra.mxu1 %v502_v57 }
  0x5e   :  { %697 = vmatprep.subr.mxu0 %v146_v42  ;;  %749 = vmatprep.subr.mxu1 %v875_v25 }
  0x5f   :  { %698 = vmatpush3.msra.mxu0 %v130_v43  ;;  %750 = vmatpush3.msra.mxu1 %v501_v58 }
  0x60   :  { %699 = vmatprep.subr.mxu0 %v145_v44  ;;  %751 = vmatprep.subr.mxu1 %v875_v25 }
  0x61   :  { %700 = vmatpush3.msra.mxu0 %v129_v45  ;;  %752 = vmatpush3.msra.mxu1 %v500_v59 }
  0x62   :  { %701 = vmatprep.subr.mxu0 %v144_v46  ;;  %753 = vmatprep.subr.mxu1 %v875_v25 }
  0x63   :  { %702 = vmatpush3.msra.mxu0 %v128_v47  ;;  %754 = vmatpush3.msra.mxu1 %v499_v60 }
  0x64   :  { %703 = vmatprep.subr.mxu0 %v143_v48  ;;  %755 = vmatprep.subr.mxu1 %v875_v25 }
  0x65   :  { %704 = vmatpush3.msra.mxu0 %v127_v49  ;;  %756 = vmatpush3.msra.mxu1 %v498_v61 }
  0x66   :  { %705 = vmatprep.subr.mxu0 %v142_v50  ;;  %757 = vmatprep.subr.mxu1 %v875_v25 }
  0x67   :  { %706 = vmatpush3.msra.mxu0 %v126_v51  ;;  %758 = vmatpush3.msra.mxu1 %v497_v62 }
  0x68   :  { %416 = vmatmul.mubr.f32.vlgmr.msra.gmra.mxu0 %v922_v16  ;;  %759 = vmatprep.subr.mxu1 %v875_v25 }
  0x69   :  { %760 = vmatpush3.msra.mxu1 %v496_v63 }
  0x6a   :  { %761 = vmatprep.subr.mxu1 %v875_v25 }
  0x6b   :  { %762 = vmatpush3.msra.mxu1 %v495_v0 }
  0x6c   :  { %763 = vmatprep.subr.mxu1 %v875_v25 }
  0x6d   :  { %764 = vmatpush3.msra.mxu1 %v494_v1 }
  0x6e   :  { %765 = vmatprep.subr.mxu1 %v875_v25 }
  0x6f   :  { %766 = vmatpush3.msra.mxu1 %v493_v2 }
  0x70   :  { %767 = vmatprep.subr.mxu1 %v875_v25 }
  0x71   :  { %768 = vmatpush3.msra.mxu1 %v492_v3 }
 0x106   :  { %v637_v8 = vpop.f32.mrf.mxu0 }
 0x108   :  { %v638_v9 = vpop.f32.mrf.mxu0 }
 0x109   :  { %v672_v4 = vpop.f32.mrf.mxu1  ;;  %v639_v10 = vadd.f32 %v638_v9, %v637_v8 }
 0x10b   :  { %v673_v5 = vpop.f32.mrf.mxu1  ;;  %v278_v12 = vadd.f32 %v639_v10, %v602_v11 }
 0x10c   :  { %v674_v13 = vadd.f32 %v673_v5, %v672_v4 }
 0x10e   :  { %v348_v16 = vadd.f32 %v674_v13, %v278_v12 }
 0x110   :  { %v487_v6 = vpop.f32.mrf.mxu1 }
 0x112   :  { %v736_v7 = vpop.f32.mrf.mxu1 }
 0x128   :  { %v707_v14 = vpop.f32.mrf.mxu0 }
 0x12a   :  { %v708_v15 = vpop.f32.mrf.mxu0 }
 0x12b   :  { %v709_v17 = vadd.f32 %v708_v15, %v707_v14 }
 0x12d   :  { %v418_v18 = vadd.f32 %v709_v17, %v348_v16 }
 0x12f   :  { %v488_v19 = vadd.f32 %v487_v6, %v418_v18 }
 0x131   :  { %v491_v20 = vmax.f32 %v488_v19, 0.0 }
 0x133   :  { %770 = vmatmul.mubr.f32.vlgmr.msra.gmra.mxu1 %v491_v20 }
 0x1f3   :  { %v581_v22 = vpop.f32.mrf.mxu1 }
 0x1f4   :  { %v582_v23 = vadd.f32 %v604_v21, %v581_v22 }
 0x1f5   :  { %v771_v24 = vpop.f32.mrf.mxu1 }
 0x1f6   :  { %585 = vst [vmem:[#allocation8] sm:$0x3] %v582_v23 }
 0x1f7   :  { %854 = shalt.err (!%p851_p5)
}
 0x1f8   :  { %595 = dma.vmem_to_hbm [thread:$0]  %s593_s12, 32, %s962_s5, [#allocation4]  }
 0x1f9   :  { %867 = dma.done.wait [#allocation4], 32  }
 0x1fa   :  { %868 = vsyncadd [#allocation4], 4294967264 }
 0x1fb   :  { %599 = vsyncpa [#allocation3], 1 }
 0x1fc   :  { %600 = vsyncpa [#allocation6], 1 }
 0x1fd   :  { %601 = vsyncpa [#allocation4], 1 }

</bundles_post_ra>
